<compile_context>
chip_gen: v6e
topology: v6e:2x2x1
jax: 0.10.0
libtpu: 0.0.40
codegen_flags: <defaults>
</compile_context>

<pallas_src>
import numpy as np
import jax
import jax.numpy as jnp
from jax.experimental import pallas as pl
from jax.experimental.pallas import tpu as pltpu


def mixing_kernel(qT_ref, s_ref, w1_ref, b1_ref, w2_ref, b2_ref,
                  w3_ref, b3_ref, wo_ref, bo_ref, out_ref):
    f32 = jnp.float32
    # fc1 + relu  (bf16 operands, f32 accumulation on the MXU)
    h = jnp.dot(s_ref[...], w1_ref[...], preferred_element_type=f32) + b1_ref[...]
    h = jnp.maximum(h, 0.0)
    # fc2 + relu
    h = jnp.dot(h.astype(w2_ref.dtype), w2_ref[...],
                preferred_element_type=f32) + b2_ref[...]
    h = jnp.maximum(h, 0.0)
    # fc3, computed transposed so the batch lands on the lane axis:
    #   wT[a, b] = sum_h w3[a, h] * h[b, h]      (w3 is row-padded to AP >= 8)
    wT = jax.lax.dot_general(
        w3_ref[...], h.astype(w3_ref.dtype),
        dimension_numbers=(((1,), (1,)), ((), ())),
        preferred_element_type=f32)                       # (AP, block_b)
    A = qT_ref.shape[0]
    w_abs = jnp.abs(wT[:A, :] + b3_ref[...])              # (A, block_b)
    # weighted sum of per-agent Q-values -> lane-dense (1, block_b) row,
    # with the 1-feature output_layer fused in as a scalar affine (VPU + SMEM).
    q_total = jnp.sum(qT_ref[...] * w_abs, axis=0, keepdims=True)
    out_ref[...] = (q_total * wo_ref[0, 0] + bo_ref[0, 0]).astype(out_ref.dtype)


def mixing_network(q_values, state, params, *, block_b=512, vmem_limit_bytes=None):
    B, A = q_values.shape
    S = state.shape[1]
    w1, b1 = params["w1"], params["b1"]
    w2, b2 = params["w2"], params["b2"]
    w3p, b3 = params["w3p"], params["b3"]
    wo, bo = params["wo"], params["bo"]
    H = w1.shape[1]
    AP = w3p.shape[0]
    assert AP >= A and b3.shape == (A, 1)

    # Lane-dense batch tile: multiple of 128 (sweep 256-1024 at training scale).
    # At large B keep the grid length >= 2 so v7x's two TensorCores both get work.
    block_b = max(128, min(block_b, pl.cdiv(B, 128) * 128))
    block_b -= block_b % 128
    num_blocks = pl.cdiv(B, block_b)
    Bp = num_blocks * block_b

    # Pad the batch to a tile multiple; padded rows are sliced away below.
    if Bp != B:
        q_values = jnp.pad(q_values, ((0, Bp - B), (0, 0)))
        state = jnp.pad(state, ((0, Bp - B), (0, 0)))

    qT = q_values.astype(jnp.float32).T      # (A, Bp): tiny, batch on lanes
    s_lo = state.astype(w1.dtype)            # bf16 state halves the dominant DMA

    def bcast(shape):
        # whole-array block, identical block index every grid step -> stays resident
        return pl.BlockSpec(shape, lambda i: (0,) * len(shape))

    out = pl.pallas_call(
        mixing_kernel,
        out_shape=jax.ShapeDtypeStruct((1, Bp), jnp.float32),
        grid=(num_blocks,),
        in_specs=[
            pl.BlockSpec((A, block_b), lambda i: (0, i)),        # q_values^T
            pl.BlockSpec((block_b, S), lambda i: (i, 0)),        # state (bf16)
            bcast((S, H)), bcast((1, H)),                        # fc1
            bcast((H, H)), bcast((1, H)),                        # fc2
            bcast((AP, H)), bcast((A, 1)),                       # fc3 (row-padded) + bias col
            pl.BlockSpec(memory_space=pltpu.MemorySpace.SMEM),   # output_layer weight (1,1)
            pl.BlockSpec(memory_space=pltpu.MemorySpace.SMEM),   # output_layer bias  (1,1)
        ],
        out_specs=pl.BlockSpec((1, block_b), lambda i: (0, i)),  # lane-dense output row
        compiler_params=pltpu.CompilerParams(
            dimension_semantics=("parallel",),
            vmem_limit_bytes=vmem_limit_bytes,  # raise explicitly if block_b gets huge on v7x
        ),
    )(qT, s_lo, w1, b1, w2, b2, w3p, b3, wo, bo)

    return out[0, :B].reshape(B, 1)


def orthogonal_weight(rng, out_f, in_f):
    """Deterministic orthogonal init matching torch.nn.init.orthogonal_ semantics."""
    a = rng.standard_normal((out_f, in_f)).astype(np.float32)
    transposed = out_f < in_f
    if transposed:
        a = a.T
    q, r = np.linalg.qr(a)
    q = q * np.sign(np.diagonal(r))
    if transposed:
        q = q.T
    return q.astype(np.float32)


def make_params(state_dim, hidden_dim, n_agents, seed=0):
    rng = np.random.default_rng(seed)
    w1 = orthogonal_weight(rng, hidden_dim, state_dim)   # torch layout (out, in) = (H, S)
    w2 = orthogonal_weight(rng, hidden_dim, hidden_dim)  # (H, H)
    w3 = orthogonal_weight(rng, n_agents, hidden_dim)    # (A, H)
    wo = orthogonal_weight(rng, 1, n_agents)             # (1, A); scalar when A == 1
    AP = max(8, -(-n_agents // 8) * 8)                   # pad fc3 rows so its matmul has M >= 8
    w3p = np.zeros((AP, hidden_dim), np.float32)
    w3p[:n_agents] = w3
    return {
        # fc1 / fc2 pre-transposed to (in, out), bf16 for the MXU
        "w1": jnp.asarray(w1.T, jnp.bfloat16),
        "b1": jnp.zeros((1, hidden_dim), jnp.float32),
        "w2": jnp.asarray(w2.T, jnp.bfloat16),
        "b2": jnp.zeros((1, hidden_dim), jnp.float32),
        # fc3 kept in torch (out, in) orientation, zero-padded rows; bias as a column
        "w3p": jnp.asarray(w3p, jnp.bfloat16),
        "b3": jnp.zeros((n_agents, 1), jnp.float32),
        # output_layer as (1,1) f32 SMEM scalars (well-defined for n_agents == 1)
        "wo": jnp.asarray(wo[:, :1], jnp.float32).reshape(1, 1),
        "bo": jnp.zeros((1, 1), jnp.float32),
    }


def mixing_network_ref(q_values, state, p):
    """Pure-JAX reference using the same bf16 operands / f32 accumulation."""
    A = q_values.shape[1]
    f32 = jnp.float32
    s = state.astype(p["w1"].dtype)
    h = jnp.maximum(jnp.dot(s, p["w1"], preferred_element_type=f32) + p["b1"], 0.0)
    h = jnp.maximum(jnp.dot(h.astype(p["w2"].dtype), p["w2"],
                            preferred_element_type=f32) + p["b2"], 0.0)
    w = jnp.dot(h.astype(p["w3p"].dtype), p["w3p"][:A].T,
                preferred_element_type=f32) + p["b3"].T
    w = jnp.abs(w)
    q_total = jnp.sum(q_values.astype(f32) * w, axis=1, keepdims=True)
    return q_total * p["wo"][0, 0] + p["bo"][0, 0]


if __name__ == "__main__":
    batch = 16
    state_dim = 32
    hidden_dim = 32
    n_agents = 1   # see shape note at top of file

    key = jax.random.PRNGKey(0)
    kq, ks = jax.random.split(key)
    q_values = jax.random.normal(kq, (batch, n_agents), dtype=jnp.float32)
    state = jax.random.normal(ks, (batch, state_dim), dtype=jnp.float32)

    params = make_params(state_dim, hidden_dim, n_agents, seed=0)

    out = mixing_network(q_values, state, params, block_b=512)
    out = jax.block_until_ready(out)

    ref = mixing_network_ref(q_values, state, params)
    assert out.shape == (batch, 1)
    assert jnp.allclose(out, ref, atol=1e-3, rtol=1e-3), (out, ref)

    print("KERNEL_OK")
</pallas_src>

<mosaic_0001>
module attributes {stable_mosaic.version = 11 : i64} {
  func.func @mixing_kernel(%arg0: i32, %arg1: memref<1x128xf32, #tpu.memory_space<vmem>>, %arg2: memref<128x32xbf16, #tpu.memory_space<vmem>>, %arg3: memref<32x32xbf16, #tpu.memory_space<vmem>>, %arg4: memref<1x32xf32, #tpu.memory_space<vmem>>, %arg5: memref<32x32xbf16, #tpu.memory_space<vmem>>, %arg6: memref<1x32xf32, #tpu.memory_space<vmem>>, %arg7: memref<8x32xbf16, #tpu.memory_space<vmem>>, %arg8: memref<1x1xf32, #tpu.memory_space<vmem>>, %arg9: memref<1x1xf32, #tpu.memory_space<smem>>, %arg10: memref<1x1xf32, #tpu.memory_space<smem>>, %arg11: memref<1x128xf32, #tpu.memory_space<vmem>>) attributes {dimension_semantics = [#tpu.dimension_semantics<parallel>], iteration_bounds = array<i64: 1>, scalar_prefetch = 0 : i64, scratch_operands = 0 : i64, tpu.core_type = #tpu.core_type<tc>, window_params = [{transform_indices = @transform_0, window_bounds = array<i64: 1, 128>}, {transform_indices = @transform_1, window_bounds = array<i64: 128, 32>}, {pipeline_mode = #tpu.pipeline_mode<synchronous>, transform_indices = @transform_2, window_bounds = array<i64: 32, 32>}, {pipeline_mode = #tpu.pipeline_mode<synchronous>, transform_indices = @transform_3, window_bounds = array<i64: 1, 32>}, {pipeline_mode = #tpu.pipeline_mode<synchronous>, transform_indices = @transform_4, window_bounds = array<i64: 32, 32>}, {pipeline_mode = #tpu.pipeline_mode<synchronous>, transform_indices = @transform_5, window_bounds = array<i64: 1, 32>}, {pipeline_mode = #tpu.pipeline_mode<synchronous>, transform_indices = @transform_6, window_bounds = array<i64: 8, 32>}, {pipeline_mode = #tpu.pipeline_mode<synchronous>, transform_indices = @transform_7, window_bounds = array<i64: 1, 1>}, {transform_indices = @transform_8, window_bounds = array<i64: 1, 1>}, {transform_indices = @transform_9, window_bounds = array<i64: 1, 1>}, {transform_indices = @transform_10, window_bounds = array<i64: 1, 128>}]} {
    %c0 = arith.constant 0 : index
    %c0_0 = arith.constant 0 : index
    %0 = vector.load %arg2[%c0, %c0_0] : memref<128x32xbf16, #tpu.memory_space<vmem>>, vector<128x32xbf16>
    %c0_1 = arith.constant 0 : index
    %c0_2 = arith.constant 0 : index
    %1 = vector.load %arg3[%c0_1, %c0_2] : memref<32x32xbf16, #tpu.memory_space<vmem>>, vector<32x32xbf16>
    %cst = arith.constant dense<0.000000e+00> : vector<128x32xf32>
    %2 = tpu.matmul %0, %1, %cst {dimension_numbers = #tpu.dot_dimension_numbers<[1], [0], [0], [1], [0, 0, 1, 1], [], []>} : vector<128x32xbf16>, vector<32x32xbf16>, vector<128x32xf32> -> vector<128x32xf32>
    %c0_3 = arith.constant 0 : index
    %c0_4 = arith.constant 0 : index
    %3 = vector.load %arg4[%c0_3, %c0_4] : memref<1x32xf32, #tpu.memory_space<vmem>>, vector<1x32xf32>
    %4 = vector.broadcast %3 : vector<1x32xf32> to vector<128x32xf32>
    %5 = arith.addf %2, %4 : vector<128x32xf32>
    %cst_5 = arith.constant 0.000000e+00 : f32
    %6 = vector.broadcast %cst_5 : f32 to vector<128x32xf32>
    %7 = arith.maximumf %5, %6 : vector<128x32xf32>
    %8 = arith.truncf %7 : vector<128x32xf32> to vector<128x32xbf16>
    %c0_6 = arith.constant 0 : index
    %c0_7 = arith.constant 0 : index
    %9 = vector.load %arg5[%c0_6, %c0_7] : memref<32x32xbf16, #tpu.memory_space<vmem>>, vector<32x32xbf16>
    %cst_8 = arith.constant dense<0.000000e+00> : vector<128x32xf32>
    %10 = tpu.matmul %8, %9, %cst_8 {dimension_numbers = #tpu.dot_dimension_numbers<[1], [0], [0], [1], [0, 0, 1, 1], [], []>} : vector<128x32xbf16>, vector<32x32xbf16>, vector<128x32xf32> -> vector<128x32xf32>
    %c0_9 = arith.constant 0 : index
    %c0_10 = arith.constant 0 : index
    %11 = vector.load %arg6[%c0_9, %c0_10] : memref<1x32xf32, #tpu.memory_space<vmem>>, vector<1x32xf32>
    %12 = vector.broadcast %11 : vector<1x32xf32> to vector<128x32xf32>
    %13 = arith.addf %10, %12 : vector<128x32xf32>
    %cst_11 = arith.constant 0.000000e+00 : f32
    %14 = vector.broadcast %cst_11 : f32 to vector<128x32xf32>
    %15 = arith.maximumf %13, %14 : vector<128x32xf32>
    %c0_12 = arith.constant 0 : index
    %c0_13 = arith.constant 0 : index
    %16 = vector.load %arg7[%c0_12, %c0_13] : memref<8x32xbf16, #tpu.memory_space<vmem>>, vector<8x32xbf16>
    %17 = arith.truncf %15 : vector<128x32xf32> to vector<128x32xbf16>
    %cst_14 = arith.constant dense<0.000000e+00> : vector<8x128xf32>
    %18 = tpu.matmul %16, %17, %cst_14 {dimension_numbers = #tpu.dot_dimension_numbers<[1], [1], [0], [0], [0, 0, 1, 0], [], []>} : vector<8x32xbf16>, vector<128x32xbf16>, vector<8x128xf32> -> vector<8x128xf32>
    %19 = vector.extract_strided_slice %18 {offsets = [0, 0], sizes = [1, 128], strides = [1, 1]} : vector<8x128xf32> to vector<1x128xf32>
    %c0_15 = arith.constant 0 : index
    %c0_16 = arith.constant 0 : index
    %20 = vector.load %arg8[%c0_15, %c0_16] : memref<1x1xf32, #tpu.memory_space<vmem>>, vector<1x1xf32>
    %21 = vector.broadcast %20 : vector<1x1xf32> to vector<1x128xf32>
    %22 = arith.addf %19, %21 : vector<1x128xf32>
    %23 = math.absf %22 : vector<1x128xf32>
    %c0_17 = arith.constant 0 : index
    %c0_18 = arith.constant 0 : index
    %24 = vector.load %arg1[%c0_17, %c0_18] : memref<1x128xf32, #tpu.memory_space<vmem>>, vector<1x128xf32>
    %25 = arith.mulf %24, %23 : vector<1x128xf32>
    %cst_19 = arith.constant dense<0.000000e+00> : vector<128xf32>
    %26 = vector.multi_reduction <add>, %25, %cst_19 [0] : vector<1x128xf32> to vector<128xf32>
    %27 = vector.shape_cast %26 : vector<128xf32> to vector<1x128xf32>
    %c0_20 = arith.constant 0 : index
    %c0_21 = arith.constant 0 : index
    %28 = memref.load %arg9[%c0_20, %c0_21] : memref<1x1xf32, #tpu.memory_space<smem>>
    %29 = vector.broadcast %28 : f32 to vector<1x128xf32>
    %30 = arith.mulf %27, %29 : vector<1x128xf32>
    %c0_22 = arith.constant 0 : index
    %c0_23 = arith.constant 0 : index
    %31 = memref.load %arg10[%c0_22, %c0_23] : memref<1x1xf32, #tpu.memory_space<smem>>
    %32 = vector.broadcast %31 : f32 to vector<1x128xf32>
    %33 = arith.addf %30, %32 : vector<1x128xf32>
    %c0_24 = arith.constant 0 : index
    %c0_25 = arith.constant 0 : index
    %34 = vector.load %arg11[%c0_24, %c0_25] : memref<1x128xf32, #tpu.memory_space<vmem>>, vector<1x128xf32>
    tpu.vector_store %arg11[%c0_24, %c0_25], %33 {strides = array<i32>} : memref<1x128xf32, #tpu.memory_space<vmem>>, vector<1x128xf32>,
    return
  }
  func.func @transform_0(%arg0: i32) -> (i32, i32) {
    %c0_i32 = arith.constant 0 : i32
    %c0_i32_0 = arith.constant 0 : i32
    return %c0_i32, %arg0 : i32, i32
  }
  func.func @transform_1(%arg0: i32) -> (i32, i32) {
    %c0_i32 = arith.constant 0 : i32
    %c0_i32_0 = arith.constant 0 : i32
    return %arg0, %c0_i32 : i32, i32
  }
  func.func @transform_2(%arg0: i32) -> (i32, i32) {
    %c0_i32 = arith.constant 0 : i32
    %c0_i32_0 = arith.constant 0 : i32
    %c0_i32_1 = arith.constant 0 : i32
    return %c0_i32, %c0_i32_0 : i32, i32
  }
  func.func @transform_3(%arg0: i32) -> (i32, i32) {
    %c0_i32 = arith.constant 0 : i32
    %c0_i32_0 = arith.constant 0 : i32
    %c0_i32_1 = arith.constant 0 : i32
    return %c0_i32, %c0_i32_0 : i32, i32
  }
  func.func @transform_4(%arg0: i32) -> (i32, i32) {
    %c0_i32 = arith.constant 0 : i32
    %c0_i32_0 = arith.constant 0 : i32
    %c0_i32_1 = arith.constant 0 : i32
    return %c0_i32, %c0_i32_0 : i32, i32
  }
  func.func @transform_5(%arg0: i32) -> (i32, i32) {
    %c0_i32 = arith.constant 0 : i32
    %c0_i32_0 = arith.constant 0 : i32
    %c0_i32_1 = arith.constant 0 : i32
    return %c0_i32, %c0_i32_0 : i32, i32
  }
  func.func @transform_6(%arg0: i32) -> (i32, i32) {
    %c0_i32 = arith.constant 0 : i32
    %c0_i32_0 = arith.constant 0 : i32
    %c0_i32_1 = arith.constant 0 : i32
    return %c0_i32, %c0_i32_0 : i32, i32
  }
  func.func @transform_7(%arg0: i32) -> (i32, i32) {
    %c0_i32 = arith.constant 0 : i32
    %c0_i32_0 = arith.constant 0 : i32
    %c0_i32_1 = arith.constant 0 : i32
    return %c0_i32, %c0_i32_0 : i32, i32
  }
  func.func @transform_8(%arg0: i32) -> (i32, i32) {
    %c0_i32 = arith.constant 0 : i32
    %c0_i32_0 = arith.constant 0 : i32
    %c0_i32_1 = arith.constant 0 : i32
    return %c0_i32, %c0_i32_0 : i32, i32
  }
  func.func @transform_9(%arg0: i32) -> (i32, i32) {
    %c0_i32 = arith.constant 0 : i32
    %c0_i32_0 = arith.constant 0 : i32
    %c0_i32_1 = arith.constant 0 : i32
    return %c0_i32, %c0_i32_0 : i32, i32
  }
  func.func @transform_10(%arg0: i32) -> (i32, i32) {
    %c0_i32 = arith.constant 0 : i32
    %c0_i32_0 = arith.constant 0 : i32
    return %c0_i32, %arg0 : i32, i32
  }
}

</mosaic_0001>

<bundles_post_ra>
// kernel: tpu_custom_call.1
= control target key start
LH: loop header
LB: loop body
LE: loop exit
PB: predicated region body
PF: predicated region fallthrough
CT: control target
= control target key end

     0   :  { %s868_s0 = inlined_call_operand.vmem [shape: f32[1,128], index: 0, kind: input, shape index: {}]   ;;  %s869_s1 = inlined_call_operand.vmem [shape: bf16[128,32], index: 1, kind: input, shape index: {}]   ;;  %s870_s2 = inlined_call_operand.vmem [shape: bf16[32,32], index: 2, kind: input, shape index: {}]   ;;  %s871_s3 = inlined_call_operand.vmem [shape: f32[1,32], index: 3, kind: input, shape index: {}]   ;;  %s872_s4 = inlined_call_operand.vmem [shape: bf16[32,32], index: 4, kind: input, shape index: {}]   ;;  %s873_s5 = inlined_call_operand.vmem [shape: f32[1,32], index: 5, kind: input, shape index: {}]   ;;  %s874_s6 = inlined_call_operand.vmem [shape: bf16[8,32], index: 6, kind: input, shape index: {}]   ;;  %s875_s7 = inlined_call_operand.<no memory space> [shape: f32[1,1], index: 7, kind: input, shape index: {}]   ;;  %s876_s8 = inlined_call_operand.<no memory space> [shape: f32[1,1], index: 8, kind: input, shape index: {}]   ;;  %s877_s9 = inlined_call_operand.<no memory space> [shape: f32[1,1], index: 9, kind: input, shape index: {}]   ;;  %s878_s10 = inlined_call_operand.hbm [shape: f32[1,128], index: 10, kind: output, shape index: {}]  }
   0x1   :  { %v15_v0 = vstv %s875_s7 }
   0x2   :  { %16 = vst [vmem:[#allocation2] sm:$0x1] %v15_v0 }
   0x3   :  { %v663_v1 = vld [vmem:[%s870_s2 + $0x8] sm:$0xff]   ;;  %v664_v2 = vld [vmem:[%s870_s2] sm:$0xff]   ;;  %vm120_vm0 = vcmask 261120   ;;  %v667_v5 = vld [vmem:[%s869_s1 + $0x10] sm:$0xff]  }
   0x4   :  { %598 = vmatprep.subr.bf16.mxu1 %v663_v1  ;;  %v665_v3 = vld [vmem:[%s869_s1] sm:$0xff]   ;;  %v666_v4 = vld [vmem:[%s869_s1 + $0x8] sm:$0xff]  }
   0x5   :  { %599 = vmatpush3.bf16.msra.mxu1 %v663_v1  ;;  %602 = vmatprep.mubr.msk.bf16.mxu1 %vm120_vm0, %v665_v3  ;;  %v673_v6 = vld [vmem:[%s872_s4 + $0x8] sm:$0xff]   ;;  %v674_v7 = vld [vmem:[%s872_s4] sm:$0xff]  }
   0x6   :  { %600 = vmatprep.subr.bf16.mxu1 %v664_v2 }
   0x9   :  { %601 = vmatpush3.bf16.msra.mxu1 %v664_v2 }
   0xa   :  { %618 = vmatprep.subr.bf16.mxu1 %v673_v6 }
   0xc   :  { %603 = vmatmul.mubr.msk.bf16.vlgmr.msra.gmra.mxu1 %vm120_vm0, %v666_v4 }
   0xd   :  { %606 = vmatprep.mubr.msk.bf16.mxu1 %vm120_vm0, %v667_v5 }
   0xe   :  { %19 = vsyncpa [#allocation6], 0  ;;  %619 = vmatpush3.bf16.msra.mxu1 %v673_v6  ;;  %v668_v8 = vld [vmem:[%s869_s1 + $0x18] sm:$0xff]   ;;  %v669_v9 = vld [vmem:[%s869_s1 + $0x20] sm:$0xff]   ;;  %v697_v6 = vmov 0.0   ;;  %vm698_vm1 = vmmov 0  }
   0xf   :  { %620 = vmatprep.subr.bf16.mxu1 %v674_v7  ;;  %v670_v10 = vld [vmem:[%s869_s1 + $0x28] sm:$0xff]   ;;  %v671_v11 = vld [vmem:[%s869_s1 + $0x30] sm:$0xff]   ;;  %v672_v12 = vld [vmem:[%s869_s1 + $0x38] sm:$0xff]   ;;  %638 = vmatprep.subr.bf16.mxu0 %v697_v6  ;;  %s700_s23 = smov [#allocation5]  }
  0x10   :  { %v538_v15 = vld [vmem:[%s871_s3] ss:$0 sm:$0xff]  ;;  %654 = vmatprep.mubr.msk.bf16.mxu0 %vm698_vm1, %v697_v6  ;;  %s530_s2 = sshll.u32 %s700_s23, 4  ;;  %s531_s2 = int_to_ptr.vmem [resolvable:$true] %s530_s2 }
  0x11   :  { %s679_s24 = scalar_lea.vmem %s531_s2, 32  ;;  %p680_p1 = scmp.lt.s32.totalorder %s531_s2, %s531_s2 }
  0x12   :  { %621 = vmatpush3.bf16.msra.mxu1 %v674_v7  ;;  %v502_v7 = vld [vmem:[#allocation2] sm:$0x1] }
  0x14   :  { %607 = vmatmul.mubr.msk.bf16.gmra.mxu1 %vm120_vm0, %v668_v8  ;;  %v699_v8 = vmov 0  }
  0x15   :  { %610 = vmatprep.mubr.msk.bf16.mxu1 %vm120_vm0, %v669_v9  ;;  %662 = vset.pattern.permute.xlu0 %v699_v8 }
  0x16   :  { %505 = vperm.xlu0 %662, %v502_v7  }
  0x1c   :  { %611 = vmatmul.mubr.msk.bf16.gmra.mxu1 %vm120_vm0, %v670_v10  ;;  %v819_v10 = vld [vmem:[%s873_s5] ss:$0 sm:$0xff] }
  0x1d   :  { %614 = vmatprep.mubr.msk.bf16.mxu1 %vm120_vm0, %v671_v11 }
  0x24   :  { %615 = vmatmul.mubr.msk.bf16.gmra.mxu1 %vm120_vm0, %v672_v12 }
  0xcc   :  { %v604_v13 = vpop.f32.mrf.mxu1 }
  0xcd   :  { %v188_v19 = vadd.f32 %v604_v13, %v538_v15 }
  0xce   :  { %v179_v14 = vpop.f32.mrf.mxu1 }
  0xcf   :  { %v180_v17 = vadd.f32 %v538_v15, %v179_v14  ;;  %v244_v26 = vmax.f32 %v188_v19, 0.0 }
  0xd0   :  { %v605_v16 = vpop.f32.mrf.mxu1 }
  0xd1   :  { %v191_v18 = vadd.f32 %v605_v16, %v538_v15  ;;  %v242_v24 = vmax.f32 %v180_v17, 0.0 }
  0xd2   :  { %v182_v20 = vpop.f32.mrf.mxu1 }
  0xd3   :  { %v183_v21 = vadd.f32 %v538_v15, %v182_v20  ;;  %v245_v22 = vmax.f32 %v191_v18, 0.0 }
  0xd4   :  { %v608_v23 = vpop.f32.mrf.mxu1 }
  0xd5   :  { %v243_v25 = vmax.f32 %v183_v21, 0.0  ;;  %v259_v29 = vpack.c.bf16 %v245_v22, %v244_v26  ;;  %v204_v33 = vadd.f32 %v608_v23, %v538_v15 }
  0xd6   :  { %v195_v27 = vpop.f32.mrf.mxu1 }
  0xd7   :  { %v258_v28 = vpack.c.bf16 %v243_v25, %v242_v24  ;;  %v196_v31 = vadd.f32 %v538_v15, %v195_v27  ;;  %v248_v40 = vmax.f32 %v204_v33, 0.0 }
  0xd8   :  { %v609_v30 = vpop.f32.mrf.mxu1 }
  0xd9   :  { %v207_v32 = vadd.f32 %v609_v30, %v538_v15  ;;  %622 = vmatprep.mubr.msk.bf16.mxu1 %vm120_vm0, %v258_v28  ;;  %v246_v38 = vmax.f32 %v196_v31, 0.0 }
  0xda   :  { %v198_v34 = vpop.f32.mrf.mxu1  ;;  %623 = vmatmul.mubr.msk.bf16.vlgmr.msra.gmra.mxu1 %vm120_vm0, %v259_v29 }
  0xdb   :  { %v199_v35 = vadd.f32 %v538_v15, %v198_v34  ;;  %v249_v36 = vmax.f32 %v207_v32, 0.0 }
  0xdc   :  { %v612_v37 = vpop.f32.mrf.mxu1 }
  0xdd   :  { %v247_v39 = vmax.f32 %v199_v35, 0.0  ;;  %v261_v43 = vpack.c.bf16 %v249_v36, %v248_v40  ;;  %v220_v47 = vadd.f32 %v612_v37, %v538_v15 }
  0xde   :  { %v211_v41 = vpop.f32.mrf.mxu1 }
  0xdf   :  { %v260_v42 = vpack.c.bf16 %v247_v39, %v246_v38  ;;  %v212_v45 = vadd.f32 %v538_v15, %v211_v41  ;;  %v252_v54 = vmax.f32 %v220_v47, 0.0 }
  0xe0   :  { %v613_v44 = vpop.f32.mrf.mxu1 }
  0xe1   :  { %v223_v46 = vadd.f32 %v613_v44, %v538_v15  ;;  %626 = vmatprep.mubr.msk.bf16.mxu1 %vm120_vm0, %v260_v42  ;;  %v250_v52 = vmax.f32 %v212_v45, 0.0 }
  0xe2   :  { %v214_v48 = vpop.f32.mrf.mxu1  ;;  %627 = vmatmul.mubr.msk.bf16.gmra.mxu1 %vm120_vm0, %v261_v43 }
  0xe3   :  { %v215_v49 = vadd.f32 %v538_v15, %v214_v48  ;;  %v253_v50 = vmax.f32 %v223_v46, 0.0 }
  0xe4   :  { %v616_v51 = vpop.f32.mrf.mxu1 }
  0xe5   :  { %v251_v53 = vmax.f32 %v215_v49, 0.0  ;;  %v263_v57 = vpack.c.bf16 %v253_v50, %v252_v54  ;;  %v236_v61 = vadd.f32 %v616_v51, %v538_v15 }
  0xe6   :  { %v227_v55 = vpop.f32.mrf.mxu1 }
  0xe7   :  { %v262_v56 = vpack.c.bf16 %v251_v53, %v250_v52  ;;  %v228_v59 = vadd.f32 %v538_v15, %v227_v55  ;;  %v256_v3 = vmax.f32 %v236_v61, 0.0 }
  0xe8   :  { %v617_v58 = vpop.f32.mrf.mxu1 }
  0xe9   :  { %v239_v60 = vadd.f32 %v617_v58, %v538_v15  ;;  %630 = vmatprep.mubr.msk.bf16.mxu1 %vm120_vm0, %v262_v56  ;;  %v254_v1 = vmax.f32 %v228_v59, 0.0 }
  0xea   :  { %v230_v62 = vpop.f32.mrf.mxu1  ;;  %631 = vmatmul.mubr.msk.bf16.gmra.mxu1 %vm120_vm0, %v263_v57 }
  0xeb   :  { %v231_v63 = vadd.f32 %v538_v15, %v230_v62  ;;  %v257_v0 = vmax.f32 %v239_v60, 0.0 }
  0xed   :  { %v255_v2 = vmax.f32 %v231_v63, 0.0  ;;  %v265_v5 = vpack.c.bf16 %v257_v0, %v256_v3 }
  0xef   :  { %v264_v4 = vpack.c.bf16 %v255_v2, %v254_v1 }
  0xf1   :  { %634 = vmatprep.mubr.msk.bf16.mxu1 %vm120_vm0, %v264_v4 }
  0xf2   :  { %635 = vmatmul.mubr.msk.bf16.gmra.mxu1 %vm120_vm0, %v265_v5 }
 0x19a   :  { %v624_v9 = vpop.f32.mrf.mxu1 }
 0x19b   :  { %v356_v12 = vadd.f32 %v624_v9, %v819_v10 }
 0x19c   :  { %v347_v11 = vpop.f32.mrf.mxu1 }
 0x19d   :  { %v348_v14 = vadd.f32 %v819_v10, %v347_v11  ;;  %v412_v17 = vmax.f32 %v356_v12, 0.0  ;;  %v426_v11 = vld [vmem:[%s874_s6] sm:$0xf]  ;;  %v508_v12 = vlaneseq }
 0x19e   :  { %v625_v13 = vpop.f32.mrf.mxu1 }
 0x19f   :  { %v359_v15 = vadd.f32 %v625_v13, %v819_v10  ;;  %v410_v21 = vmax.f32 %v348_v14, 0.0  ;;  %v509_v13 = vshrl.u32 %v508_v12, 7 }
 0x1a0   :  { %v350_v16 = vpop.f32.mrf.mxu1 }
 0x1a1   :  { %v413_v18 = vmax.f32 %v359_v15, 0.0  ;;  %v351_v19 = vadd.f32 %v819_v10, %v350_v16  ;;  %v510_v14 = vsub.s32 0, %v509_v13  ;;  %v506_v15 = vpop.permute.xlu0 %505 }
 0x1a2   :  { %v628_v20 = vpop.f32.mrf.mxu1 }
 0x1a3   :  { %v428_v22 = vpack.c.bf16 %v413_v18, %v412_v17  ;;  %v411_v23 = vmax.f32 %v351_v19, 0.0  ;;  %v372_v60 = vadd.f32 %v628_v20, %v819_v10  ;;  %v511_v16 = vrot.slane %v506_v15, %v510_v14 }
 0x1a4   :  { %v363_v24 = vpop.f32.mrf.mxu1 }
 0x1a5   :  { %v427_v25 = vpack.c.bf16 %v411_v23, %v410_v21  ;;  %v416_v63 = vmax.f32 %v372_v60, 0.0  ;;  %v364_v2 = vadd.f32 %v819_v10, %v363_v24  ;;  %v442_v9 = vsel %vm120_vm0, %v428_v22, 0 }
 0x1a6   :  { %v629_v26 = vpop.f32.mrf.mxu1  ;;  %v518_v22 = vstv %s876_s8 }
 0x1a7   :  { %v375_v58 = vadd.f32 %v629_v26, %v819_v10  ;;  %v414_v5 = vmax.f32 %v364_v2, 0.0 }
 0x1a8   :  { %v366_v27 = vpop.f32.mrf.mxu1 }
 0x1a9   :  { %v417_v61 = vmax.f32 %v375_v58, 0.0  ;;  %v367_v1 = vadd.f32 %v819_v10, %v366_v27 }
 0x1aa   :  { %v632_v28 = vpop.f32.mrf.mxu1 }
 0x1ab   :  { %v388_v48 = vadd.f32 %v632_v28, %v819_v10  ;;  %v430_v0 = vpack.c.bf16 %v417_v61, %v416_v63  ;;  %v415_v3 = vmax.f32 %v367_v1, 0.0 }
 0x1ac   :  { %v379_v29 = vpop.f32.mrf.mxu1 }
 0x1ad   :  { %v420_v51 = vmax.f32 %v388_v48, 0.0  ;;  %v380_v54 = vadd.f32 %v819_v10, %v379_v29  ;;  %v448_v4 = vsel %vm120_vm0, %v430_v0, 0  ;;  %v429_v7 = vpack.c.bf16 %v415_v3, %v414_v5 }
 0x1ae   :  { %v633_v30 = vpop.f32.mrf.mxu1 }
 0x1af   :  { %v391_v46 = vadd.f32 %v633_v30, %v819_v10  ;;  %v418_v57 = vmax.f32 %v380_v54, 0.0  ;;  %v445_v8 = vsel %vm120_vm0, %v429_v7, 0 }
 0x1b0   :  { %v382_v31 = vpop.f32.mrf.mxu1 }
 0x1b1   :  { %v421_v49 = vmax.f32 %v391_v46, 0.0  ;;  %v383_v53 = vadd.f32 %v819_v10, %v382_v31 }
 0x1b2   :  { %v636_v32 = vpop.f32.mrf.mxu1 }
 0x1b3   :  { %v404_v34 = vadd.f32 %v636_v32, %v819_v10  ;;  %v432_v52 = vpack.c.bf16 %v421_v49, %v420_v51  ;;  %v419_v55 = vmax.f32 %v383_v53, 0.0 }
 0x1b4   :  { %v395_v33 = vpop.f32.mrf.mxu1 }
 0x1b5   :  { %v424_v38 = vmax.f32 %v404_v34, 0.0  ;;  %v396_v41 = vadd.f32 %v819_v10, %v395_v33  ;;  %v454_v56 = vsel %vm120_vm0, %v432_v52, 0  ;;  %v431_v59 = vpack.c.bf16 %v419_v55, %v418_v57 }
 0x1b6   :  { %v637_v35 = vpop.f32.mrf.mxu1 }
 0x1b7   :  { %v407_v36 = vadd.f32 %v637_v35, %v819_v10  ;;  %v422_v45 = vmax.f32 %v396_v41, 0.0  ;;  %v451_v62 = vsel %vm120_vm0, %v431_v59, 0 }
 0x1b8   :  { %v398_v37 = vpop.f32.mrf.mxu1 }
 0x1b9   :  { %v425_v39 = vmax.f32 %v407_v36, 0.0  ;;  %v399_v40 = vadd.f32 %v819_v10, %v398_v37  ;;  %v439_v10 = vsel %vm120_vm0, %v427_v25, 0  ;;  %v521_v25 = vstv %s877_s9 }
 0x1bb   :  { %v434_v42 = vpack.c.bf16 %v425_v39, %v424_v38  ;;  %v423_v43 = vmax.f32 %v399_v40, 0.0 }
 0x1bd   :  { %v460_v44 = vsel %vm120_vm0, %v434_v42, 0  ;;  %v433_v47 = vpack.c.bf16 %v423_v43, %v422_v45 }
 0x1be   :  { %639 = vmatpush3.bf16.xpose.msra.mxu0 %v460_v44 }
 0x1bf   :  { %640 = vmatprep.subr.bf16.mxu0 %v697_v6  ;;  %v457_v50 = vsel %vm120_vm0, %v433_v47, 0 }
 0x1c6   :  { %641 = vmatpush3.bf16.xpose.msra.mxu0 %v457_v50 }
 0x1c7   :  { %642 = vmatprep.subr.bf16.mxu0 %v697_v6 }
 0x1ce   :  { %643 = vmatpush3.bf16.xpose.msra.mxu0 %v454_v56 }
 0x1cf   :  { %644 = vmatprep.subr.bf16.mxu0 %v697_v6 }
 0x1d6   :  { %645 = vmatpush3.bf16.xpose.msra.mxu0 %v451_v62 }
 0x1d7   :  { %646 = vmatprep.subr.bf16.mxu0 %v697_v6 }
 0x1de   :  { %647 = vmatpush3.bf16.xpose.msra.mxu0 %v448_v4 }
 0x1df   :  { %648 = vmatprep.subr.bf16.mxu0 %v697_v6 }
 0x1e6   :  { %649 = vmatpush3.bf16.xpose.msra.mxu0 %v445_v8 }
 0x1e7   :  { %650 = vmatprep.subr.bf16.mxu0 %v697_v6 }
 0x1ee   :  { %651 = vmatpush3.bf16.xpose.msra.mxu0 %v442_v9 }
 0x1ef   :  { %652 = vmatprep.subr.bf16.mxu0 %v697_v6  ;;  %v514_v6 = vld [vmem:[%s868_s0] sm:$0x1]  ;;  %s675_s0 = scalar_lea.vmem %s531_s2, 16 }
 0x1f0   :  { %p676_p0 = scmp.ne.s32.totalorder %s531_s2, %s675_s0  ;;  %p681_p2 = scmp.lt.s32.totalorder %s679_s24, %s675_s0 }
 0x1f2   :  { %p682_p3 = por %p681_p2, %p680_p1 }
 0x1f4   :  { %p683_p4 = pnand %p682_p3, %p676_p0 }
 0x1f6   :  { %653 = vmatpush3.bf16.xpose.msra.mxu0 %v439_v10 }
 0x1fd   :  { %655 = vmatmul.mubr.msk.bf16.vlgmr.msra.gmra.mxu0 %vm120_vm0, %v426_v11 }
 0x2bd   :  { %v496_v17 = vpop.f32.mrf.mxu0 }
 0x2be   :  { %v512_v18 = vadd.f32 %v511_v16, %v496_v17 }
 0x2bf   :  { %v656_v19 = vpop.f32.mrf.mxu0 }
 0x2c0   :  { %v513_v20 = vand.u32 2147483647, %v512_v18 }
 0x2c1   :  { %v499_v21 = vpop.f32.mrf.mxu0 }
 0x2c2   :  { %v515_v23 = vmul.f32 %v514_v6, %v513_v20 }
 0x2c3   :  { %v657_v24 = vpop.f32.mrf.mxu0 }
 0x2c4   :  { %v519_v26 = vmul.f32 %v518_v22, %v515_v23 }
 0x2c6   :  { %v522_v27 = vadd.f32 %v521_v25, %v519_v26 }
 0x2c8   :  { %523 = vst [vmem:[#allocation5] sm:$0x1] %v522_v27 }
 0x2c9   :  { %686 = shalt.err (!%p683_p4)
}
 0x2ca   :  { %533 = dma.vmem_to_hbm [thread:$0]  %s531_s2, 16, %s878_s10, [#allocation6]  }
 0x2cb   :  { %695 = dma.done.wait [#allocation6], 16  }
 0x2cc   :  { %696 = vsyncadd [#allocation6], 4294967280 }
 0x2cd   :  { %537 = vsyncpa [#allocation6], 1 }

</bundles_post_ra>
